<compile_context>
chip_gen: v6e
topology: v6e:2x2x1
jax: 0.10.0
libtpu: 0.0.40
codegen_flags: <defaults>
</compile_context>

<pallas_src>
import functools

import jax
import jax.numpy as jnp
from jax.experimental import pallas as pl
from jax.experimental.pallas import tpu as pltpu

LANES = 128
MAX_BLOCK_BYTES = 4 << 20      # per-input, per-tile DMA size cap (~4 MiB)
VMEM_LIMIT_BYTES = 40 << 20    # 2 inputs x 2 bufs x 4 MiB = 16 MiB; 40 MiB fits
                               # physical VMEM on v5e/v6e/v7x


def _charbonnier_partial_kernel(x_ref, y_ref, o_ref, *, eps_sq, partial_rows):
    # Widen in-register (no wrapper-side upcast / extra HBM round trip).
    x = x_ref[...].astype(jnp.float32)
    y = y_ref[...].astype(jnp.float32)
    diff = x - y
    val = jnp.sqrt(diff * diff + jnp.float32(eps_sq))
    # (block_rows, 128) -> (groups, partial_rows, 128): tile-aligned reshape,
    # then a leading-axis sum = partial_rows//8 independent VPU accumulation
    # chains; keeps the kernel HBM-bound even on fast-HBM parts.
    o_ref[...] = val.reshape(-1, partial_rows, LANES).sum(axis=0)


def _sublane_pack(dtype):
    # Packed-sublane row multiple: 8 (f32), 16 (bf16/f16), 32 (int8/fp8).
    itemsize = jnp.dtype(dtype).itemsize
    return max(8, (4 // itemsize) * 8)


def charbonnier_loss(x, y, eps=1e-3, max_block_bytes=MAX_BLOCK_BYTES):
    assert x.shape == y.shape
    n = int(x.size)
    eps_sq = float(eps) * float(eps)

    xf = x.reshape(-1)
    yf = y.reshape(-1)

    # Dtype-aware tiling: packed sublane multiple + byte-based block cap so
    # bf16 inputs stream tiles as large (in bytes) as f32 ones.
    pack = max(_sublane_pack(xf.dtype), _sublane_pack(yf.dtype))
    max_itemsize = max(jnp.dtype(xf.dtype).itemsize, jnp.dtype(yf.dtype).itemsize)
    cap_rows = max(pack, (max_block_bytes // (LANES * max_itemsize)) // pack * pack)

    rows_needed = pl.cdiv(n, LANES)
    block_rows = min(cap_rows, pl.cdiv(rows_needed, pack) * pack)
    elems_per_block = block_rows * LANES

    # Bulk/tail split: no jnp.pad of the full inputs.  The bulk (a whole
    # number of blocks) goes through the kernel; the < 1-block tail is pure
    # JAX (cheap: at most ~max_block_bytes of elementwise work).
    num_blocks = n // elems_per_block
    bulk_n = num_blocks * elems_per_block
    tail = n - bulk_n

    total = jnp.float32(0.0)

    if num_blocks > 0:
        bulk_rows = num_blocks * block_rows
        x2d = (xf if tail == 0 else xf[:bulk_n]).reshape(bulk_rows, LANES)
        y2d = (yf if tail == 0 else yf[:bulk_n]).reshape(bulk_rows, LANES)

        # Largest f32-tile-aligned partial height that divides block_rows.
        partial_rows = 8
        for cand in (64, 32, 16):
            if block_rows % cand == 0:
                partial_rows = cand
                break

        kernel = functools.partial(
            _charbonnier_partial_kernel, eps_sq=eps_sq, partial_rows=partial_rows)

        out_rows = num_blocks * partial_rows
        bytes_accessed = (
            x2d.size * x2d.dtype.itemsize
            + y2d.size * y2d.dtype.itemsize
            + out_rows * LANES * 4
        )

        partials = pl.pallas_call(
            kernel,
            out_shape=jax.ShapeDtypeStruct((out_rows, LANES), jnp.float32),
            grid_spec=pltpu.PrefetchScalarGridSpec(
                num_scalar_prefetch=0,
                grid=(num_blocks,),
                in_specs=[
                    pl.BlockSpec((block_rows, LANES), lambda i: (i, 0)),
                    pl.BlockSpec((block_rows, LANES), lambda i: (i, 0)),
                ],
                out_specs=pl.BlockSpec((partial_rows, LANES), lambda i: (i, 0)),
            ),
            compiler_params=pltpu.CompilerParams(
                dimension_semantics=("parallel",),
                vmem_limit_bytes=VMEM_LIMIT_BYTES,
            ),
            cost_estimate=pl.CostEstimate(
                flops=4 * bulk_n,
                transcendentals=bulk_n,
                bytes_accessed=bytes_accessed,
            ),
        )(x2d, y2d)

        total = total + jnp.sum(partials, dtype=jnp.float32)

    if tail:
        # TODO(synk): a fully zero-copy tail would need a manual-DMA (pl.ANY)
        # path; the tail is < one block so pure JAX is cheap enough.
        xt = xf[bulk_n:].astype(jnp.float32)
        yt = yf[bulk_n:].astype(jnp.float32)
        d = xt - yt
        total = total + jnp.sum(
            jnp.sqrt(d * d + jnp.float32(eps_sq)), dtype=jnp.float32)

    return total / jnp.float32(n)


if __name__ == "__main__":
    key = jax.random.PRNGKey(0)
    kx, ky = jax.random.split(key)
    # NCHW, matching the PyTorch convention.
    x = jax.random.normal(kx, (2, 4, 16, 16), dtype=jnp.float32)
    y = jax.random.normal(ky, (2, 4, 16, 16), dtype=jnp.float32)

    loss = charbonnier_loss(x, y, eps=1e-3)
    jax.block_until_ready(loss)

    # Pure-JAX reference check.
    diff = x - y
    ref = jnp.mean(jnp.sqrt(diff * diff + 1e-3 * 1e-3))
    assert jnp.allclose(loss, ref, rtol=1e-5, atol=1e-6), (loss, ref)

    # Misaligned-size path (bulk kernel + pure-JAX tail) sanity check.
    x2 = jax.random.normal(kx, (3, 3, 17, 13), dtype=jnp.float32)
    y2 = jax.random.normal(ky, (3, 3, 17, 13), dtype=jnp.float32)
    loss2 = charbonnier_loss(x2, y2, eps=1e-3)
    jax.block_until_ready(loss2)
    d2 = x2 - y2
    ref2 = jnp.mean(jnp.sqrt(d2 * d2 + 1e-3 * 1e-3))
    assert jnp.allclose(loss2, ref2, rtol=1e-5, atol=1e-6), (loss2, ref2)

    print("KERNEL_OK")
</pallas_src>

<mosaic_0001>
module attributes {stable_mosaic.version = 11 : i64} {
  func.func @_charbonnier_partial_kernel(%arg0: i32, %arg1: memref<16x128xf32, #tpu.memory_space<vmem>>, %arg2: memref<16x128xf32, #tpu.memory_space<vmem>>, %arg3: memref<16x128xf32, #tpu.memory_space<vmem>>) attributes {dimension_semantics = [#tpu.dimension_semantics<parallel>], iteration_bounds = array<i64: 1>, scalar_prefetch = 0 : i64, scratch_operands = 0 : i64, tpu.core_type = #tpu.core_type<tc>, window_params = [{transform_indices = @transform_0, window_bounds = array<i64: 16, 128>}, {transform_indices = @transform_1, window_bounds = array<i64: 16, 128>}, {transform_indices = @transform_2, window_bounds = array<i64: 16, 128>}]} {
    %c0 = arith.constant 0 : index
    %c0_0 = arith.constant 0 : index
    %0 = vector.load %arg1[%c0, %c0_0] : memref<16x128xf32, #tpu.memory_space<vmem>>, vector<16x128xf32>
    %c0_1 = arith.constant 0 : index
    %c0_2 = arith.constant 0 : index
    %1 = vector.load %arg2[%c0_1, %c0_2] : memref<16x128xf32, #tpu.memory_space<vmem>>, vector<16x128xf32>
    %2 = arith.subf %0, %1 : vector<16x128xf32>
    %3 = arith.mulf %2, %2 : vector<16x128xf32>
    %cst = arith.constant 9.99999997E-7 : f32
    %4 = vector.broadcast %cst : f32 to vector<16x128xf32>
    %5 = arith.addf %3, %4 : vector<16x128xf32>
    %6 = math.sqrt %5 : vector<16x128xf32>
    %7 = vector.shape_cast %6 : vector<16x128xf32> to vector<1x16x128xf32>
    %cst_3 = arith.constant dense<0.000000e+00> : vector<16x128xf32>
    %8 = vector.multi_reduction <add>, %7, %cst_3 [0] : vector<1x16x128xf32> to vector<16x128xf32>
    %c0_4 = arith.constant 0 : index
    %c0_5 = arith.constant 0 : index
    %9 = vector.load %arg3[%c0_4, %c0_5] : memref<16x128xf32, #tpu.memory_space<vmem>>, vector<16x128xf32>
    tpu.vector_store %arg3[%c0_4, %c0_5], %8 {strides = array<i32>} : memref<16x128xf32, #tpu.memory_space<vmem>>, vector<16x128xf32>,
    return
  }
  func.func @transform_0(%arg0: i32) -> (i32, i32) {
    %c0_i32 = arith.constant 0 : i32
    %c0_i32_0 = arith.constant 0 : i32
    return %arg0, %c0_i32 : i32, i32
  }
  func.func @transform_1(%arg0: i32) -> (i32, i32) {
    %c0_i32 = arith.constant 0 : i32
    %c0_i32_0 = arith.constant 0 : i32
    return %arg0, %c0_i32 : i32, i32
  }
  func.func @transform_2(%arg0: i32) -> (i32, i32) {
    %c0_i32 = arith.constant 0 : i32
    %c0_i32_0 = arith.constant 0 : i32
    return %arg0, %c0_i32 : i32, i32
  }
}

</mosaic_0001>

<bundles_post_ra>
// kernel: tpu_custom_call.1
= control target key start
LH: loop header
LB: loop body
LE: loop exit
PB: predicated region body
PF: predicated region fallthrough
CT: control target
= control target key end

     0   :  { %7 = vsyncpa [#allocation3], 0  ;;  %s199_s0 = inlined_call_operand.hbm [shape: f32[16,128], index: 0, kind: input, shape index: {}]   ;;  %s200_s1 = inlined_call_operand.hbm [shape: f32[16,128], index: 1, kind: input, shape index: {}]   ;;  %s201_s2 = inlined_call_operand.hbm [shape: f32[16,128], index: 2, kind: output, shape index: {}]  }
   0x1   :  { %8 = vsyncpa [#allocation6], 0 }
   0x2   :  { %9 = vsyncpa [#allocation4], 0  ;;  %s161_s9 = smov [#allocation2]  }
   0x3   :  { %s15_s10 = sshll.u32 %s161_s9, 4  ;;  %s16_s10 = int_to_ptr.vmem [resolvable:$true] %s15_s10 }
   0x4   :  { %s103_s11 = scalar_lea.vmem %s16_s10, 256  ;;  %p108_p1 = scmp.lt.s32.totalorder %s16_s10, %s16_s10 }
   0x5   :  { %p104_p0 = scmp.ne.s32.totalorder %s16_s10, %s103_s11  ;;  %p109_p2 = scmp.lt.s32.totalorder %s103_s11, %s103_s11 }
   0x7   :  { %p110_p3 = por %p109_p2, %p108_p1 }
   0x9   :  { %p111_p4 = pnand %p110_p3, %p104_p0 }
   0xb   :  { %114 = shalt.err (!%p111_p4)
}
   0xc   :  { %s162_s12 = smov 128   ;;  %s163_s13 = smov 8  }
   0xd   :  { %21 = dma.hbm_to_vmem [thread:$0]  %s199_s0, 256, %s16_s10, [#allocation3], %s162_s12, %s162_s12, %s163_s13  }
   0xe   :  { %s164_s16 = smov [#allocation5]  }
   0xf   :  { %s27_s17 = sshll.u32 %s164_s16, 4  ;;  %s28_s17 = int_to_ptr.vmem [resolvable:$true] %s27_s17 }
  0x10   :  { %s123_s18 = scalar_lea.vmem %s28_s17, 256  ;;  %p128_p6 = scmp.lt.s32.totalorder %s28_s17, %s28_s17 }
  0x11   :  { %p124_p5 = scmp.ne.s32.totalorder %s28_s17, %s123_s18  ;;  %p129_p7 = scmp.lt.s32.totalorder %s123_s18, %s123_s18 }
  0x13   :  { %p130_p8 = por %p129_p7, %p128_p6 }
  0x15   :  { %p131_p9 = pnand %p130_p8, %p124_p5 }
  0x17   :  { %134 = shalt.err (!%p131_p9)
}
  0x18   :  { %33 = dma.hbm_to_vmem [thread:$0]  %s200_s1, 256, %s28_s17, [#allocation6], %s162_s12, %s162_s12, %s163_s13  }
  0x19   :  { %155 = dma.done.wait [#allocation3], 256  }
  0x1a   :  { %156 = vsyncadd [#allocation3], 4294967040 }
  0x1b   :  { %157 = dma.done.wait [#allocation6], 256  }
  0x1c   :  { %158 = vsyncadd [#allocation6], 4294967040  ;;  %v40_v0 = vld [vmem:[#allocation2] sm:$0xff]  ;;  %v42_v1 = vld [vmem:[#allocation5] sm:$0xff]  ;;  %s165_s0 = smov [#allocation7]  }
  0x1d   :  { %v41_v2 = vld [vmem:[#allocation2 + $0x8] sm:$0xff]  ;;  %v44_v3 = vsub.f32 %v40_v0, %v42_v1  ;;  %v43_v4 = vld [vmem:[#allocation5 + $0x8] sm:$0xff]  ;;  %s73_s1 = sshll.u32 %s165_s0, 4  ;;  %s74_s1 = int_to_ptr.vmem [resolvable:$true] %s73_s1 }
  0x1e   :  { %v45_v5 = vsub.f32 %v41_v2, %v43_v4  ;;  %s135_s21 = scalar_lea.vmem %s74_s1, 256  ;;  %p140_p11 = scmp.lt.s32.totalorder %s74_s1, %s74_s1 }
  0x1f   :  { %v46_v6 = vmul.f32 %v44_v3, %v44_v3  ;;  %p136_p10 = scmp.ne.s32.totalorder %s74_s1, %s135_s21  ;;  %p141_p12 = scmp.lt.s32.totalorder %s135_s21, %s135_s21 }
  0x20   :  { %v47_v7 = vmul.f32 %v45_v5, %v45_v5 }
  0x21   :  { %v48_v8 = vadd.f32 1e-06, %v46_v6  ;;  %p142_p13 = por %p141_p12, %p140_p11 }
  0x22   :  { %v49_v9 = vadd.f32 1e-06, %v47_v7 }
  0x23   :  { %91 = vrsqrt.f32 %v48_v8  ;;  %vm52_vm0 = vcmp.eq.f32.partialorder %v48_v8, inf  ;;  %v55_v11 = vand.u32 2147483648, %v48_v8  ;;  %vm54_vm1 = vcmp.eq.f32.partialorder %v48_v8, 0.0  ;;  %p143_p0 = pnand %p142_p13, %p136_p10 }
  0x24   :  { %93 = vrsqrt.f32 %v49_v9  ;;  %vm59_vm2 = vcmp.eq.f32.partialorder %v49_v9, inf  ;;  %v62_v14 = vand.u32 2147483648, %v49_v9  ;;  %vm61_vm3 = vcmp.eq.f32.partialorder %v49_v9, 0.0 }
  0x30   :  { %v92_v10 = vpop.eup %91 }
  0x31   :  { %v94_v12 = vpop.eup %93  ;;  %v51_v13 = vmul.f32 %v92_v10, %v48_v8 }
  0x32   :  { %v58_v15 = vmul.f32 %v94_v12, %v49_v9 }
  0x33   :  { %v53_v16 = vsel %vm52_vm0, %v48_v8, %v51_v13 }
  0x34   :  { %v56_v17 = vsel %vm54_vm1, %v55_v11, %v53_v16  ;;  %v60_v18 = vsel %vm59_vm2, %v49_v9, %v58_v15 }
  0x35   :  { %66 = vst [vmem:[#allocation7] sm:$0xff] %v56_v17  ;;  %v63_v19 = vsel %vm61_vm3, %v62_v14, %v60_v18 }
  0x36   :  { %67 = vst [vmem:[#allocation7 + $0x8] sm:$0xff] %v63_v19 }
  0x37   :  { %146 = shalt.err (!%p143_p0)
}
  0x38   :  { %79 = dma.vmem_to_hbm [thread:$0]  %s74_s1, 256, %s201_s2, [#allocation4], %s162_s12, %s162_s12, %s163_s13  }
  0x39   :  { %159 = dma.done.wait [#allocation4], 256  }
  0x3a   :  { %160 = vsyncadd [#allocation4], 4294967040 }
  0x3b   :  { %83 = vsyncpa [#allocation3], 1 }
  0x3c   :  { %84 = vsyncpa [#allocation6], 1 }
  0x3d   :  { %85 = vsyncpa [#allocation4], 1 }

</bundles_post_ra>
